<compile_context>
chip_gen: v5e
topology: v5e:2x2
jax: 0.10.0
libtpu: 0.0.40
codegen_flags: <defaults>
</compile_context>

<pallas_src>
import functools

import numpy as np
import jax
import jax.numpy as jnp
from jax.experimental import pallas as pl
from jax.experimental.pallas import tpu as pltpu


# ----------------------------- glue (plain numpy) ------------------------------

def construct_log_spaced_freqs(max_t: float,
                               skip_small_t_freqs: int = 0,
                               skip_large_t_freqs: int = 0) -> np.ndarray:
    """Same as the PyTorch helper, in numpy."""
    time_resolution = 2.0 ** np.ceil(np.log2(max_t))
    num_fourier_feats = int(np.ceil(np.log2(time_resolution)))
    powers = (2 ** np.arange(num_fourier_feats)).astype(np.float32)
    powers = powers[skip_large_t_freqs:len(powers) - skip_small_t_freqs]
    fourier_coefs = powers * np.pi
    return (fourier_coefs / time_resolution).astype(np.float32)


def _round_up(a: int, b: int) -> int:
    return ((a + b - 1) // b) * b


# --------------------------------- Pallas kernel -------------------------------

def _scalar_encoder_kernel(x_ref, selc_ref, coef_ref, mask_ref, selv_ref,
                           vpos_ref, tbig_ref, out_ref, *,
                           x_multiplier: float, vocab: int):
    """One batch tile, batch on sublanes, final feature layout on lanes.

    x_ref:    [TB, C]       raw scalars in [0, 1]
    selc_ref: [C, D]        0/1: replicate coord c across its d_per columns
    coef_ref: [1, D]        fourier coefficient per output column (0 elsewhere)
    mask_ref: [4, D]        f32 column masks: row0=raw, row1=sin, row2=cos, row3=emb
    selv_ref: [C, C*V]      0/1: replicate coord c across its V vocab columns
    vpos_ref: [1, C*V]      vocab index per (coord, vocab) column, as f32
    tbig_ref: [C*V, D]      block-diagonal embedding table placement
    out_ref:  [TB, D]       D = C * (raw + 2F + E), PyTorch-ordered columns
    """
    hp = jax.lax.Precision.HIGHEST
    dims = (((1,), (0,)), ((), ()))
    m = jnp.float32(x_multiplier)

    x = x_ref[...].astype(jnp.float32)                                   # [TB, C]

    # Replicate each coordinate across its d_per output columns.  0/1 selection
    # matrix + HIGHEST precision => bit-exact copy of x into every column.
    x_rep = jax.lax.dot_general(x, selc_ref[...], dims, precision=hp,
                                preferred_element_type=jnp.float32)       # [TB, D]
    args = (x_rep * m) * coef_ref[...]                                    # [TB, D]

    # raw | sin | cos columns in one lane-dense pass (emb columns added below).
    out = (mask_ref[0:1, :] * x_rep
           + mask_ref[1:2, :] * jnp.sin(args)
           + mask_ref[2:3, :] * jnp.cos(args))                            # [TB, D]

    # Const-embedding lookup: lane-dense one-hot over (coord, vocab) columns,
    # gathered + placed into the emb columns by one MXU matmul (exact gather
    # thanks to the 0/1 one-hot and precision=HIGHEST).
    xsv = jax.lax.dot_general(x, selv_ref[...], dims, precision=hp,
                              preferred_element_type=jnp.float32)         # [TB, C*V]
    idx = jnp.clip(jnp.round(xsv * m), 0.0, float(vocab - 1))             # clamped
    onehot = (idx == vpos_ref[...]).astype(jnp.float32)                   # [TB, C*V]
    emb = jax.lax.dot_general(onehot, tbig_ref[...], dims, precision=hp,
                              preferred_element_type=jnp.float32)         # [TB, D]

    out_ref[...] = (out + mask_ref[3:4, :] * emb).astype(out_ref.dtype)


# --------------------------------- wrapper -------------------------------------

def scalar_encoder_1d(x: jax.Array,
                      embed_table: jax.Array,
                      x_multiplier: float,
                      use_raw: bool = True,
                      skip_small_t_freqs: int = 0,
                      skip_large_t_freqs: int = 0,
                      tile_b: int = 4096,
                      out_dtype=None) -> jax.Array:
    """Pallas-backed ScalarEncoder1d.forward.  x: [B, C] -> [B, C * d_per]."""
    B, C = x.shape
    V, E = embed_table.shape
    # TODO(synk): degenerate configs (x_multiplier <= 0 or const_emb_dim == 0,
    # i.e. no Fourier / no embedding branch) are not implemented here.
    assert x_multiplier > 0 and E > 0 and C >= 1

    coefs = construct_log_spaced_freqs(float(x_multiplier),
                                       skip_small_t_freqs, skip_large_t_freqs)
    F = int(coefs.shape[0])
    raw_dim = 1 if use_raw else 0
    d_per = raw_dim + 2 * F + E
    D = C * d_per
    CV = C * V
    off_sin, off_cos, off_emb = raw_dim, raw_dim + F, raw_dim + 2 * F
    out_dtype = x.dtype if out_dtype is None else out_dtype

    # ------- compile-time constant matrices (numpy, tiny) -------
    selc = np.zeros((C, D), np.float32)       # coord -> its d_per columns
    coef_lane = np.zeros((1, D), np.float32)  # fourier coef per column
    masks = np.zeros((4, D), np.float32)      # raw / sin / cos / emb column masks
    selv = np.zeros((C, CV), np.float32)      # coord -> its V vocab columns
    vpos = np.zeros((1, CV), np.float32)      # vocab id per (coord, vocab) column
    for c in range(C):
        base = c * d_per
        selc[c, base:base + d_per] = 1.0
        if use_raw:
            masks[0, base] = 1.0
        masks[1, base + off_sin:base + off_cos] = 1.0
        masks[2, base + off_cos:base + off_emb] = 1.0
        masks[3, base + off_emb:base + d_per] = 1.0
        coef_lane[0, base + off_sin:base + off_cos] = coefs
        coef_lane[0, base + off_cos:base + off_emb] = coefs
        selv[c, c * V:(c + 1) * V] = 1.0
        vpos[0, c * V:(c + 1) * V] = np.arange(V, dtype=np.float32)

    # Block-diagonal placement of the (runtime) embedding table: row c*V+v maps
    # table[v] into coordinate c's embedding columns.
    et = embed_table.astype(jnp.float32)
    tbig = jnp.zeros((CV, D), jnp.float32)
    for c in range(C):
        tbig = tbig.at[c * V:(c + 1) * V,
                       c * d_per + off_emb:c * d_per + off_emb + E].set(et)

    # ------- batch tiling: batch on sublanes (multiple of 8) -------
    b_pad8 = _round_up(B, 8)
    tile_b = max(8, (min(int(tile_b), b_pad8) // 8) * 8)
    # v7x megacore: make sure a large batch gives >= 2 "parallel" grid steps.
    if b_pad8 > 1024 and -(-b_pad8 // tile_b) < 2:
        tile_b = max(8, _round_up(-(-b_pad8 // 2), 8))
    grid_n = -(-b_pad8 // tile_b)
    b_total = grid_n * tile_b

    x_in = x if b_total == B else jnp.pad(x, ((0, b_total - B), (0, 0)))

    kernel = functools.partial(_scalar_encoder_kernel,
                               x_multiplier=float(x_multiplier), vocab=V)

    out = pl.pallas_call(
        kernel,
        out_shape=jax.ShapeDtypeStruct((b_total, D), out_dtype),
        grid=(grid_n,),
        in_specs=[
            pl.BlockSpec((tile_b, C), lambda i: (i, 0)),   # x, batch-tiled
            pl.BlockSpec((C, D), lambda i: (0, 0)),        # selc   (resident)
            pl.BlockSpec((1, D), lambda i: (0, 0)),        # coef
            pl.BlockSpec((4, D), lambda i: (0, 0)),        # masks
            pl.BlockSpec((C, CV), lambda i: (0, 0)),       # selv
            pl.BlockSpec((1, CV), lambda i: (0, 0)),       # vpos
            pl.BlockSpec((CV, D), lambda i: (0, 0)),       # tbig
        ],
        out_specs=pl.BlockSpec((tile_b, D), lambda i: (i, 0)),
        compiler_params=pltpu.CompilerParams(
            dimension_semantics=("parallel",),             # shard tiles across TCs
            vmem_limit_bytes=48 * 1024 * 1024),
    )(x_in, jnp.asarray(selc), jnp.asarray(coef_lane), jnp.asarray(masks),
      jnp.asarray(selv), jnp.asarray(vpos), tbig)

    return out if b_total == B else out[:B]


# ------------------------------ pure-JAX reference ------------------------------

def scalar_encoder_1d_ref(x, fourier_coefs, embed_table, x_multiplier, use_raw=True):
    x_scaled = x.astype(jnp.float32) * x_multiplier
    args = x_scaled[:, :, None] * fourier_coefs[None, None, :]
    fourier = jnp.concatenate([jnp.sin(args), jnp.cos(args)], axis=2)
    idx = jnp.round(x_scaled).astype(jnp.int32)
    const = embed_table[idx]
    parts = ([x[:, :, None]] if use_raw else []) + [fourier, const]
    out = jnp.concatenate(parts, axis=2)
    return out.reshape(x.shape[0], -1)


# ----------------------------------- main ---------------------------------------

if __name__ == "__main__":
    # Module hyperparameters (small, consistent with the PyTorch __init__).
    coord_dim = 4
    x_multiplier = 16.0          # -> time_resolution=16, F=4 fourier freqs
    const_emb_dim = 8
    use_raw = True
    batch_size = 8

    key = jax.random.PRNGKey(0)
    k_x, k_emb, k_x2 = jax.random.split(key, 3)

    x = jax.random.uniform(k_x, (batch_size, coord_dim), dtype=jnp.float32)  # in [0, 1]

    fourier_coefs = jnp.asarray(construct_log_spaced_freqs(x_multiplier))    # [F]
    vocab = int(np.ceil(x_multiplier)) + 1                                    # 17
    # torch.nn.Embedding default init: N(0, 1)
    embed_table = jax.random.normal(k_emb, (vocab, const_emb_dim), dtype=jnp.float32)

    d_per = (1 if use_raw else 0) + 2 * fourier_coefs.shape[0] + const_emb_dim

    # Single-tile path.
    out = scalar_encoder_1d(x, embed_table, x_multiplier, use_raw=use_raw)
    out = jax.block_until_ready(out)
    ref = scalar_encoder_1d_ref(x, fourier_coefs, embed_table, x_multiplier, use_raw)
    assert out.shape == (batch_size, coord_dim * d_per)
    np.testing.assert_allclose(np.asarray(out), np.asarray(ref), rtol=1e-5, atol=1e-5)

    # Multi-step grid path (3 batch tiles of 8 rows) to exercise the pipeline.
    x2 = jax.random.uniform(k_x2, (24, coord_dim), dtype=jnp.float32)
    out2 = jax.block_until_ready(
        scalar_encoder_1d(x2, embed_table, x_multiplier, use_raw=use_raw, tile_b=8))
    ref2 = scalar_encoder_1d_ref(x2, fourier_coefs, embed_table, x_multiplier, use_raw)
    np.testing.assert_allclose(np.asarray(out2), np.asarray(ref2), rtol=1e-5, atol=1e-5)

    print("KERNEL_OK")
</pallas_src>

<mosaic_0001>
module attributes {stable_mosaic.version = 11 : i64} {
  func.func @_scalar_encoder_kernel(%arg0: i32, %arg1: memref<8x4xf32, #tpu.memory_space<vmem>>, %arg2: memref<4x68xf32, #tpu.memory_space<vmem>>, %arg3: memref<1x68xf32, #tpu.memory_space<vmem>>, %arg4: memref<4x68xf32, #tpu.memory_space<vmem>>, %arg5: memref<4x68xf32, #tpu.memory_space<vmem>>, %arg6: memref<1x68xf32, #tpu.memory_space<vmem>>, %arg7: memref<68x68xf32, #tpu.memory_space<vmem>>, %arg8: memref<8x68xf32, #tpu.memory_space<vmem>>) attributes {dimension_semantics = [#tpu.dimension_semantics<parallel>], iteration_bounds = array<i64: 1>, scalar_prefetch = 0 : i64, scratch_operands = 0 : i64, tpu.core_type = #tpu.core_type<tc>, window_params = [{transform_indices = @transform_0, window_bounds = array<i64: 8, 4>}, {pipeline_mode = #tpu.pipeline_mode<synchronous>, transform_indices = @transform_1, window_bounds = array<i64: 4, 68>}, {pipeline_mode = #tpu.pipeline_mode<synchronous>, transform_indices = @transform_2, window_bounds = array<i64: 1, 68>}, {pipeline_mode = #tpu.pipeline_mode<synchronous>, transform_indices = @transform_3, window_bounds = array<i64: 4, 68>}, {pipeline_mode = #tpu.pipeline_mode<synchronous>, transform_indices = @transform_4, window_bounds = array<i64: 4, 68>}, {pipeline_mode = #tpu.pipeline_mode<synchronous>, transform_indices = @transform_5, window_bounds = array<i64: 1, 68>}, {pipeline_mode = #tpu.pipeline_mode<synchronous>, transform_indices = @transform_6, window_bounds = array<i64: 68, 68>}, {transform_indices = @transform_7, window_bounds = array<i64: 8, 68>}]} {
    %c0 = arith.constant 0 : index
    %c0_0 = arith.constant 0 : index
    %0 = vector.load %arg1[%c0, %c0_0] : memref<8x4xf32, #tpu.memory_space<vmem>>, vector<8x4xf32>
    %c0_1 = arith.constant 0 : index
    %c0_2 = arith.constant 0 : index
    %1 = vector.load %arg2[%c0_1, %c0_2] : memref<4x68xf32, #tpu.memory_space<vmem>>, vector<4x68xf32>
    %cst = arith.constant dense<0.000000e+00> : vector<8x68xf32>
    %2 = tpu.matmul %0, %1, %cst {dimension_numbers = #tpu.dot_dimension_numbers<[1], [0], [0], [1], [0, 0, 1, 1], [], []>, precision = #tpu.contract_precision<fp32>} : vector<8x4xf32>, vector<4x68xf32>, vector<8x68xf32> -> vector<8x68xf32>
    %cst_3 = arith.constant 1.600000e+01 : f32
    %3 = vector.broadcast %cst_3 : f32 to vector<8x68xf32>
    %4 = arith.mulf %2, %3 : vector<8x68xf32>
    %c0_4 = arith.constant 0 : index
    %c0_5 = arith.constant 0 : index
    %5 = vector.load %arg3[%c0_4, %c0_5] : memref<1x68xf32, #tpu.memory_space<vmem>>, vector<1x68xf32>
    %6 = vector.broadcast %5 : vector<1x68xf32> to vector<8x68xf32>
    %7 = arith.mulf %4, %6 : vector<8x68xf32>
    %c0_6 = arith.constant 0 : index
    %c0_7 = arith.constant 0 : index
    %8 = vector.load %arg4[%c0_6, %c0_7] : memref<4x68xf32, #tpu.memory_space<vmem>>, vector<1x68xf32>
    %9 = vector.broadcast %8 : vector<1x68xf32> to vector<8x68xf32>
    %10 = arith.mulf %9, %2 : vector<8x68xf32>
    %c1 = arith.constant 1 : index
    %c0_8 = arith.constant 0 : index
    %11 = vector.load %arg4[%c1, %c0_8] : memref<4x68xf32, #tpu.memory_space<vmem>>, vector<1x68xf32>
    %12 = math.sin %7 : vector<8x68xf32>
    %13 = vector.broadcast %11 : vector<1x68xf32> to vector<8x68xf32>
    %14 = arith.mulf %13, %12 : vector<8x68xf32>
    %15 = arith.addf %10, %14 : vector<8x68xf32>
    %c2 = arith.constant 2 : index
    %c0_9 = arith.constant 0 : index
    %16 = vector.load %arg4[%c2, %c0_9] : memref<4x68xf32, #tpu.memory_space<vmem>>, vector<1x68xf32>
    %17 = math.cos %7 : vector<8x68xf32>
    %18 = vector.broadcast %16 : vector<1x68xf32> to vector<8x68xf32>
    %19 = arith.mulf %18, %17 : vector<8x68xf32>
    %20 = arith.addf %15, %19 : vector<8x68xf32>
    %c0_10 = arith.constant 0 : index
    %c0_11 = arith.constant 0 : index
    %21 = vector.load %arg5[%c0_10, %c0_11] : memref<4x68xf32, #tpu.memory_space<vmem>>, vector<4x68xf32>
    %cst_12 = arith.constant dense<0.000000e+00> : vector<8x68xf32>
    %22 = tpu.matmul %0, %21, %cst_12 {dimension_numbers = #tpu.dot_dimension_numbers<[1], [0], [0], [1], [0, 0, 1, 1], [], []>, precision = #tpu.contract_precision<fp32>} : vector<8x4xf32>, vector<4x68xf32>, vector<8x68xf32> -> vector<8x68xf32>
    %cst_13 = arith.constant 1.600000e+01 : f32
    %23 = vector.broadcast %cst_13 : f32 to vector<8x68xf32>
    %24 = arith.mulf %22, %23 : vector<8x68xf32>
    %25 = math.roundeven %24 : vector<8x68xf32>
    %cst_14 = arith.constant 0.000000e+00 : f32
    %cst_15 = arith.constant 1.600000e+01 : f32
    %26 = vector.broadcast %cst_14 : f32 to vector<8x68xf32>
    %27 = arith.maximumf %26, %25 : vector<8x68xf32>
    %28 = vector.broadcast %cst_15 : f32 to vector<8x68xf32>
    %29 = arith.minimumf %28, %27 : vector<8x68xf32>
    %c0_16 = arith.constant 0 : index
    %c0_17 = arith.constant 0 : index
    %30 = vector.load %arg6[%c0_16, %c0_17] : memref<1x68xf32, #tpu.memory_space<vmem>>, vector<1x68xf32>
    %31 = vector.broadcast %30 : vector<1x68xf32> to vector<8x68xf32>
    %32 = arith.cmpf oeq, %29, %31 : vector<8x68xf32>
    %33 = arith.extui %32 : vector<8x68xi1> to vector<8x68xi32>
    %34 = arith.sitofp %33 : vector<8x68xi32> to vector<8x68xf32>
    %c0_18 = arith.constant 0 : index
    %c0_19 = arith.constant 0 : index
    %35 = vector.load %arg7[%c0_18, %c0_19] : memref<68x68xf32, #tpu.memory_space<vmem>>, vector<68x68xf32>
    %cst_20 = arith.constant dense<0.000000e+00> : vector<8x68xf32>
    %36 = tpu.matmul %34, %35, %cst_20 {dimension_numbers = #tpu.dot_dimension_numbers<[1], [0], [0], [1], [0, 0, 1, 1], [], []>, precision = #tpu.contract_precision<fp32>} : vector<8x68xf32>, vector<68x68xf32>, vector<8x68xf32> -> vector<8x68xf32>
    %c3 = arith.constant 3 : index
    %c0_21 = arith.constant 0 : index
    %37 = vector.load %arg4[%c3, %c0_21] : memref<4x68xf32, #tpu.memory_space<vmem>>, vector<1x68xf32>
    %38 = vector.broadcast %37 : vector<1x68xf32> to vector<8x68xf32>
    %39 = arith.mulf %38, %36 : vector<8x68xf32>
    %40 = arith.addf %20, %39 : vector<8x68xf32>
    %c0_22 = arith.constant 0 : index
    %c0_23 = arith.constant 0 : index
    %41 = vector.load %arg8[%c0_22, %c0_23] : memref<8x68xf32, #tpu.memory_space<vmem>>, vector<8x68xf32>
    tpu.vector_store %arg8[%c0_22, %c0_23], %40 {strides = array<i32>} : memref<8x68xf32, #tpu.memory_space<vmem>>, vector<8x68xf32>,
    return
  }
  func.func @transform_0(%arg0: i32) -> (i32, i32) {
    %c0_i32 = arith.constant 0 : i32
    %c0_i32_0 = arith.constant 0 : i32
    return %arg0, %c0_i32 : i32, i32
  }
  func.func @transform_1(%arg0: i32) -> (i32, i32) {
    %c0_i32 = arith.constant 0 : i32
    %c0_i32_0 = arith.constant 0 : i32
    %c0_i32_1 = arith.constant 0 : i32
    return %c0_i32, %c0_i32_0 : i32, i32
  }
  func.func @transform_2(%arg0: i32) -> (i32, i32) {
    %c0_i32 = arith.constant 0 : i32
    %c0_i32_0 = arith.constant 0 : i32
    %c0_i32_1 = arith.constant 0 : i32
    return %c0_i32, %c0_i32_0 : i32, i32
  }
  func.func @transform_3(%arg0: i32) -> (i32, i32) {
    %c0_i32 = arith.constant 0 : i32
    %c0_i32_0 = arith.constant 0 : i32
    %c0_i32_1 = arith.constant 0 : i32
    return %c0_i32, %c0_i32_0 : i32, i32
  }
  func.func @transform_4(%arg0: i32) -> (i32, i32) {
    %c0_i32 = arith.constant 0 : i32
    %c0_i32_0 = arith.constant 0 : i32
    %c0_i32_1 = arith.constant 0 : i32
    return %c0_i32, %c0_i32_0 : i32, i32
  }
  func.func @transform_5(%arg0: i32) -> (i32, i32) {
    %c0_i32 = arith.constant 0 : i32
    %c0_i32_0 = arith.constant 0 : i32
    %c0_i32_1 = arith.constant 0 : i32
    return %c0_i32, %c0_i32_0 : i32, i32
  }
  func.func @transform_6(%arg0: i32) -> (i32, i32) {
    %c0_i32 = arith.constant 0 : i32
    %c0_i32_0 = arith.constant 0 : i32
    %c0_i32_1 = arith.constant 0 : i32
    return %c0_i32, %c0_i32_0 : i32, i32
  }
  func.func @transform_7(%arg0: i32) -> (i32, i32) {
    %c0_i32 = arith.constant 0 : i32
    %c0_i32_0 = arith.constant 0 : i32
    return %arg0, %c0_i32 : i32, i32
  }
}

</mosaic_0001>

<bundles_post_ra>
// kernel: tpu_custom_call.1
= control target key start
LH: loop header
LB: loop body
LE: loop exit
PB: predicated region body
PF: predicated region fallthrough
CT: control target
= control target key end

     0   :  { %12 = vsyncpa [#allocation3], 0  ;;  %s1330_s0 = inlined_call_operand.vmem [shape: f32[8,4], index: 0, kind: input, shape index: {}]   ;;  %s1331_s1 = inlined_call_operand.vmem [shape: f32[4,68], index: 1, kind: input, shape index: {}]   ;;  %s1332_s2 = inlined_call_operand.vmem [shape: f32[1,68], index: 2, kind: input, shape index: {}]   ;;  %s1333_s3 = inlined_call_operand.vmem [shape: f32[4,68], index: 3, kind: input, shape index: {}]   ;;  %s1334_s4 = inlined_call_operand.vmem [shape: f32[4,68], index: 4, kind: input, shape index: {}]   ;;  %s1335_s5 = inlined_call_operand.vmem [shape: f32[1,68], index: 5, kind: input, shape index: {}]   ;;  %s1336_s6 = inlined_call_operand.hbm [shape: f32[68,68], index: 6, kind: input, shape index: {}]   ;;  %s1337_s7 = inlined_call_operand.hbm [shape: f32[8,68], index: 7, kind: output, shape index: {}]  }
   0x1   :  { %13 = vsyncpa [#allocation4], 0  ;;  %s30_s26 = sshll.u32 %s1336_s6, 4  ;;  %s1062_s27 = smov [#allocation2]   ;;  %s31_s26 = int_to_ptr.hbm [resolvable:$true] %s30_s26 }
   0x2   :  { %s32_s28 = sshll.u32 %s1062_s27, 4  ;;  %s1063_s29 = smov 128   ;;  %s33_s28 = int_to_ptr.vmem [resolvable:$true] %s32_s28 }
   0x3   :  { %s1064_s30 = smov 8  }
   0x4   :  { %38 = dma.hbm_to_vmem [thread:$0]  %s31_s26, 1152, %s33_s28, [#allocation3], %s1063_s29, %s1063_s29, %s1064_s30  }
   0x5   :  { %1058 = dma.done.wait [#allocation3], 1152  }
   0x6   :  { %1059 = vsyncadd [#allocation3], 4294966144  ;;  %vm49_vm0 = vcmask 1043456   ;;  %vm45_vm1 = vcmask 31744   ;;  %v44_v0 = vld [vmem:[%s1331_s1] sm:$0xf] }
   0x7   :  { %v43_v1 = vld [vmem:[%s1330_s0] sm:$0xff]  ;;  %v51_v2 = vsel %vm49_vm0, %v44_v0, 0  ;;  %v693_v24 = vld [vmem:[#allocation2 + $0x38] sm:$0xff]  ;;  %v692_v27 = vld [vmem:[#allocation2 + $0x30] sm:$0xff]  ;;  %vm695_vm12 = vcmask 556032   ;;  %s1073_s20 = smov [#allocation5]  }
   0x8   :  { %v694_v3 = vld [vmem:[#allocation2 + $0x40] sm:$0xf]  ;;  %v47_v4 = vsel %vm45_vm1, %v43_v1, 0  ;;  %v68_v6 = vand.u32 4294901760, %v51_v2  ;;  %v1136_v26 = vand.u32 4294901760, %v693_v24  ;;  %v1142_v30 = vand.u32 4294901760, %v692_v27 }
   0x9   :  { %v525_v5 = vld [vmem:[%s1334_s4] sm:$0xf]  ;;  %v70_v7 = vand.u32 4294901760, %v47_v4  ;;  %v700_v13 = vsel %vm49_vm0, %v694_v3, 0  ;;  %v691_v34 = vld [vmem:[#allocation2 + $0x28] sm:$0xff]  ;;  %v689_v44 = vld [vmem:[#allocation2 + $0x18] sm:$0xff] }
   0xa   :  { %v527_v8 = vsel %vm49_vm0, %v525_v5, 0  ;;  %69 = vmatpush.msra.mxu2 %v68_v6  ;;  %v95_v11 = vsub.f32 %v51_v2, %v68_v6  ;;  %193 = vmatpush.msra.mxu1 %v68_v6  ;;  %v1129_v19 = vand.u32 4294901760, %v700_v13  ;;  %v1140_v29 = vsub.f32 %v693_v24, %v1136_v26  ;;  %v690_v39 = vld [vmem:[#allocation2 + $0x20] sm:$0xff]  ;;  %v688_v49 = vld [vmem:[#allocation2 + $0x10] sm:$0xff]  ;;  %v687_v54 = vld [vmem:[#allocation2 + $0x8] sm:$0xff]  ;;  %s962_s21 = sshll.u32 %s1073_s20, 4  ;;  %s963_s21 = int_to_ptr.vmem [resolvable:$true] %s962_s21 }
   0xb   :  { %v544_v9 = vand.u32 4294901760, %v527_v8  ;;  %v71_v10 = vsub.f32 %v47_v4, %v70_v7  ;;  %195 = vmatmul.f32.vlgmr.msra.gmra.mxu1 %v70_v7  ;;  %v1152_v33 = vsub.f32 %v692_v27, %v1142_v30  ;;  %v1161_v38 = vand.u32 4294901760, %v691_v34  ;;  %v686_v60 = vld [vmem:[#allocation2] sm:$0xff]  ;;  %s964_s24 = sshll.u32 %s1337_s7, 4  ;;  %s965_s24 = int_to_ptr.hbm [resolvable:$true] %s964_s24 }
   0xc   :  { %v96_v15 = vand.u32 4294901760, %v95_v11  ;;  %122 = vmatpush.msrb.mxu2 %v95_v11  ;;  %v1134_v25 = vsub.f32 %v700_v13, %v1129_v19  ;;  %v751_v32 = vand.u32 4294901760, %v1140_v29  ;;  %v1170_v43 = vand.u32 4294901760, %v690_v39  ;;  %v1004_v24 = vld [vmem:[%s1332_s2] ss:$0 sm:$0xff] }
   0xd   :  { %v571_v12 = vsub.f32 %v527_v8, %v544_v9  ;;  %v72_v14 = vand.u32 4294901760, %v71_v10  ;;  %621 = vmatpush.msrb.mxu1 %v544_v9  ;;  %v757_v37 = vand.u32 4294901760, %v1152_v33  ;;  %v1168_v42 = vsub.f32 %v691_v34, %v1161_v38 }
   0xe   :  { %v97_v18 = vsub.f32 %v95_v11, %v96_v15  ;;  %171 = vmatpush.msra.mxu0 %v96_v15  ;;  %v745_v28 = vand.u32 4294901760, %v1134_v25  ;;  %v752_v36 = vsub.f32 %v1140_v29, %v751_v32  ;;  %v1176_v47 = vsub.f32 %v690_v39, %v1170_v43 }
   0xf   :  { %v572_v16 = vand.u32 4294901760, %v571_v12  ;;  %v73_v17 = vsub.f32 %v71_v10, %v72_v14  ;;  %173 = vmatmul.f32.vlgmr.msra.gmra.mxu0 %v70_v7  ;;  %v758_v41 = vsub.f32 %v1152_v33, %v757_v37  ;;  %v763_v46 = vand.u32 4294901760, %v1168_v42 }
  0x10   :  { %v98_v22 = vand.u32 4294901760, %v97_v18  ;;  %598 = vmatpush.msrb.mxu0 %v571_v12  ;;  %v746_v31 = vsub.f32 %v1134_v25, %v745_v28  ;;  %v753_v40 = vand.u32 4294901760, %v752_v36  ;;  %v1178_v48 = vand.u32 4294901760, %v689_v44 }
  0x11   :  { %v573_v20 = vsub.f32 %v571_v12, %v572_v16  ;;  %v74_v21 = vand.u32 4294901760, %v73_v17  ;;  %v759_v45 = vand.u32 4294901760, %v758_v41  ;;  %v764_v50 = vsub.f32 %v1168_v42, %v763_v46 }
  0x12   :  { %710 = vmatpush.msra.mxu0 %v1129_v19  ;;  %99 = vmatpush.msra.mxu3 %v98_v22  ;;  %v747_v35 = vand.u32 4294901760, %v746_v31  ;;  %v769_v51 = vand.u32 4294901760, %v1176_v47  ;;  %v774_v52 = vsub.f32 %v689_v44, %v1178_v48  ;;  %v1186_v53 = vand.u32 4294901760, %v688_v49 }
  0x13   :  { %v574_v23 = vand.u32 4294901760, %v573_v20  ;;  %75 = vmatmul.f32.vlgmr.msra.gmra.mxu2 %v74_v21  ;;  %101 = vmatmul.f32.vlgmr.msra.gmra.mxu3 %v70_v7  ;;  %v765_v55 = vand.u32 4294901760, %v764_v50  ;;  %v1194_v59 = vand.u32 4294901760, %v687_v54  ;;  %v1197_v0 = vand.u32 4294901760, %v686_v60 }
  0x14   :  { %545 = vmatpush.msra.mxu2 %v544_v9  ;;  %145 = vmatpush.msrb.mxu3 %v68_v6  ;;  %v770_v56 = vsub.f32 %v1176_v47, %v769_v51  ;;  %v775_v57 = vand.u32 4294901760, %v774_v52  ;;  %v780_v58 = vsub.f32 %v688_v49, %v1186_v53 }
  0x15   :  { %625 = vmatmul.f32.vlgmr.msrb.gmra.mxu1 %v72_v14  ;;  %712 = vmatpush.msra.mxu0 %v1136_v26  ;;  %v786_v2 = vsub.f32 %v687_v54, %v1194_v59  ;;  %v792_v8 = vsub.f32 %v686_v60, %v1197_v0  ;;  %v1068_v60 = vmov 2102212464  }
  0x16   :  { %575 = vmatpush.msra.mxu3 %v574_v23  ;;  %748 = vmatpush.msra.mxu1 %v747_v35  ;;  %v771_v61 = vand.u32 4294901760, %v770_v56  ;;  %v776_v62 = vsub.f32 %v774_v52, %v775_v57  ;;  %v781_v63 = vand.u32 4294901760, %v780_v58 }
  0x17   :  { %601 = vmatmul.f32.vlgmr.msrb.gmra.mxu0 %v71_v10  ;;  %v793_v11 = vand.u32 4294901760, %v792_v8 }
  0x18   :  { %714 = vmatpush.msra.mxu0 %v1142_v30  ;;  %754 = vmatpush.msra.mxu1 %v753_v40  ;;  %v777_v4 = vand.u32 4294901760, %v776_v62  ;;  %v782_v5 = vsub.f32 %v780_v58, %v781_v63 }
  0x19   :  { %v794_v13 = vsub.f32 %v792_v8, %v793_v11 }
  0x1a   :  { %716 = vmatpush.msra.mxu0 %v1161_v38  ;;  %760 = vmatpush.msra.mxu1 %v759_v45 }
  0x1b   :  { %125 = vmatmul.f32.vlgmr.msrb.gmra.mxu2 %v71_v10  ;;  %149 = vmatmul.f32.vlgmr.msrb.gmra.mxu3 %v72_v14 }
  0x1c   :  { %647 = vmatpush.msrb.mxu2 %v572_v16  ;;  %669 = vmatpush.msrb.mxu3 %v544_v9  ;;  %v783_v9 = vand.u32 4294901760, %v782_v5  ;;  %v795_v16 = vand.u32 4294901760, %v794_v13 }
  0x1d   :  { %718 = vmatpush.msra.mxu0 %v1170_v43  ;;  %766 = vmatpush.msra.mxu1 %v765_v55 }
  0x1f   :  { %720 = vmatpush.msra.mxu0 %v1178_v48  ;;  %772 = vmatpush.msra.mxu1 %v771_v61 }
  0x21   :  { %722 = vmatpush.msra.mxu0 %v1186_v53  ;;  %778 = vmatpush.msra.mxu1 %v777_v4 }
  0x23   :  { %551 = vmatmul.f32.vlgmr.msra.gmra.mxu2 %v74_v21  ;;  %577 = vmatmul.f32.vlgmr.msra.gmra.mxu3 %v70_v7 }
  0x24   :  { %850 = vmatpush.msra.mxu3 %v1129_v19  ;;  %811 = vmatpush.msra.mxu2 %v1134_v25 }
  0x25   :  { %724 = vmatpush.msra.mxu0 %v1194_v59  ;;  %784 = vmatpush.msra.mxu1 %v783_v9 }
  0x26   :  { %852 = vmatpush.msra.mxu3 %v1136_v26  ;;  %814 = vmatpush.msra.mxu2 %v1140_v29 }
  0x27   :  { %726 = vmatpush.msra.mxu0 %v1197_v0 }
  0x28   :  { %854 = vmatpush.msra.mxu3 %v1142_v30  ;;  %817 = vmatpush.msra.mxu2 %v1152_v33 }
  0x29   :  { %884 = vmatpush.msrb.mxu0 %v745_v28 }
  0x2a   :  { %856 = vmatpush.msra.mxu3 %v1161_v38  ;;  %820 = vmatpush.msra.mxu2 %v1168_v42 }
  0x2b   :  { %649 = vmatmul.f32.vlgmr.msrb.gmra.mxu2 %v70_v7  ;;  %671 = vmatmul.f32.vlgmr.msrb.gmra.mxu3 %v70_v7  ;;  %v787_v7 = vand.u32 4294901760, %v786_v2 }
  0x2c   :  { %858 = vmatpush.msra.mxu3 %v1170_v43  ;;  %823 = vmatpush.msra.mxu2 %v1176_v47 }
  0x2d   :  { %v788_v10 = vsub.f32 %v786_v2, %v787_v7  ;;  %888 = vmatpush.msrb.mxu0 %v751_v32 }
  0x2e   :  { %860 = vmatpush.msra.mxu3 %v1178_v48  ;;  %826 = vmatpush.msra.mxu2 %v774_v52 }
  0x2f   :  { %v789_v12 = vand.u32 4294901760, %v788_v10  ;;  %892 = vmatpush.msrb.mxu0 %v757_v37 }
  0x30   :  { %862 = vmatpush.msra.mxu3 %v1186_v53  ;;  %829 = vmatpush.msra.mxu2 %v780_v58 }
  0x31   :  { %790 = vmatpush.msra.mxu1 %v789_v12  ;;  %896 = vmatpush.msrb.mxu0 %v763_v46 }
  0x32   :  { %864 = vmatpush.msra.mxu3 %v1194_v59  ;;  %832 = vmatpush.msra.mxu2 %v786_v2  ;;  %v1070_v2 = vmov 1326507024  }
  0x33   :  { %796 = vmatpush.msra.mxu1 %v795_v16  ;;  %900 = vmatpush.msrb.mxu0 %v769_v51  ;;  %v1065_v51 = vmov 683565275  }
  0x34   :  { %835 = vmatpush.msra.mxu2 %v792_v8  ;;  %866 = vmatpush.msra.mxu3 %v1197_v0 }
  0x35   :  { %930 = vmatpush.msrb.mxu1 %v1129_v19  ;;  %904 = vmatpush.msrb.mxu0 %v775_v57  ;;  %v1067_v57 = vmov 2131351028  }
  0x37   :  { %932 = vmatpush.msrb.mxu1 %v1136_v26  ;;  %908 = vmatpush.msrb.mxu0 %v781_v63  ;;  %v1069_v63 = vmov 920167782  }
  0x39   :  { %934 = vmatpush.msrb.mxu1 %v1142_v30  ;;  %912 = vmatpush.msrb.mxu0 %v787_v7 }
  0x3b   :  { %936 = vmatpush.msrb.mxu1 %v1161_v38  ;;  %916 = vmatpush.msrb.mxu0 %v793_v11 }
  0x3d   :  { %938 = vmatpush.msrb.mxu1 %v1170_v43 }
  0x3f   :  { %940 = vmatpush.msrb.mxu1 %v1178_v48 }
  0x41   :  { %942 = vmatpush.msrb.mxu1 %v1186_v53  ;;  %v1066_v53 = vmov 2475754826  }
  0x43   :  { %944 = vmatpush.msrb.mxu1 %v1194_v59 }
  0x45   :  { %946 = vmatpush.msrb.mxu1 %v1197_v0 }
  0x88   :  { %v196_v20 = vpop.f32.mrf.mxu1 }
  0x8c   :  { %v174_v14 = vpop.f32.mrf.mxu0 }
  0x92   :  { %v626_v31 = vpop.f32.mrf.mxu1 }
  0x94   :  { %v602_v29 = vpop.f32.mrf.mxu0 }
  0x96   :  { %v76_v1 = vpop.f32.mrf.mxu2  ;;  %v102_v3 = vpop.f32.mrf.mxu3 }
  0x97   :  { %v103_v6 = vadd.f32 %v102_v3, %v76_v1 }
  0x9e   :  { %v126_v15 = vpop.f32.mrf.mxu2  ;;  %v150_v18 = vpop.f32.mrf.mxu3 }
  0x9f   :  { %v127_v17 = vadd.f32 %v126_v15, %v103_v6 }
  0xa1   :  { %v151_v21 = vadd.f32 %v150_v18, %v127_v17 }
  0xa3   :  { %v175_v22 = vadd.f32 %v174_v14, %v151_v21 }
  0xa5   :  { %v1213_v23 = vadd.f32 %v196_v20, %v175_v22 }
  0xa6   :  { %v552_v25 = vpop.f32.mrf.mxu2  ;;  %v578_v28 = vpop.f32.mrf.mxu3 }
  0xa7   :  { %v199_v27 = vmul.f32 16.0, %v1213_v23  ;;  %v579_v19 = vadd.f32 %v578_v28, %v552_v25 }
  0xa9   :  { %v1221_v26 = vmul.f32 %v1004_v24, %v199_v27  ;;  %v603_v32 = vadd.f32 %v602_v29, %v579_v19 }
  0xab   :  { %v209_v33 = vand.u32 2147483647, %v1221_v26  ;;  %v212_v30 = vand.u32 2139095040, %v1221_v26  ;;  %v627_v34 = vadd.f32 %v626_v31, %v603_v32  ;;  %vm211_vm1 = vcmp.lt.s32.totalorder %v1221_v26, 0 }
  0xad   :  { %v213_v35 = vshrl.u32 %v212_v30, 23  ;;  %v216_v36 = vand.u32 8388607, %v209_v33 }
  0xae   :  { %v650_v37 = vpop.f32.mrf.mxu2  ;;  %v672_v41 = vpop.f32.mrf.mxu3 }
  0xaf   :  { %v974_v38 = vadd.s32 4294967169, %v213_v35  ;;  %v217_v39 = vor.u32 8388608, %v216_v36  ;;  %v651_v40 = vadd.f32 %v650_v37, %v627_v34 }
  0xb1   :  { %v219_v42 = vadd.s32 1, %v974_v38  ;;  %v673_v43 = vadd.f32 %v672_v41, %v651_v40  ;;  %v1232_v44 = vshll.u32 %v217_v39, 8 }
  0xb3   :  { %vm220_vm2 = vcmp.gt.s32.totalorder %v219_v42, 0  ;;  %v1234_v46 = vmul.f32 16.0, %v673_v43  ;;  %v258_v49 = vand.u32 65535, %v1232_v44  ;;  %v259_v22 = vshrl.u32 %v1232_v44, 16 }
  0xb4   :  { %v221_v45 = vsel %vm220_vm2, %v219_v42, 0  ;;  %vm210_vm2 = vcmp.le.f32.partialorder %v209_v33, 0.7853982 }
  0xb5   :  { %v223_v47 = vand.u32 31, %v221_v45  ;;  %v1239_v50 = vshrl.u32 %v221_v45, 5  ;;  %v986_v55 = vcvt.f32.s32 %v1234_v46  ;;  %v989_v7 = vand.u32 2147483648, %v1234_v46  ;;  %v1008_v45 = vld [vmem:[%s1335_s5] ss:$0 sm:$0xff] }
  0xb6   :  { %v984_v18 = vand.u32 2147483647, %v1234_v46 }
  0xb7   :  { %v1236_v48 = vsub.s32 32, %v223_v47  ;;  %v226_v52 = vshll.u32 %v1065_v51, %v223_v47  ;;  %v229_v54 = vshll.u32 %v1066_v53, %v223_v47  ;;  %v232_v59 = vshll.u32 %v1067_v57, %v223_v47 }
  0xb8   :  { %v235_v62 = vshll.u32 %v1068_v60, %v223_v47  ;;  %v238_v1 = vshll.u32 %v1069_v63, %v223_v47  ;;  %vm241_vm3 = vcmp.lt.s32.totalorder %v1239_v50, 1  ;;  %v987_v10 = vcvt.s32.f32 %v986_v55 }
  0xb9   :  { %v227_v56 = vshrl.u32 %v1066_v53, %v1236_v48  ;;  %v230_v58 = vshrl.u32 %v1067_v57, %v1236_v48  ;;  %v233_v61 = vshrl.u32 %v1068_v60, %v1236_v48  ;;  %v236_v0 = vshrl.u32 %v1069_v63, %v1236_v48 }
  0xba   :  { %v239_v3 = vshrl.u32 %v1070_v2, %v1236_v48  ;;  %vm243_vm4 = vcmp.lt.s32.totalorder %v1239_v50, 3  ;;  %vm244_vm5 = vcmp.lt.s32.totalorder %v1239_v50, 4  ;;  %v988_v15 = vand.u32 2147483647, %v987_v10 }
  0xbb   :  { %v1248_v4 = vor.u32 %v227_v56, %v226_v52  ;;  %v1250_v5 = vor.u32 %v230_v58, %v229_v54  ;;  %v1252_v6 = vor.u32 %v233_v61, %v232_v59  ;;  %v237_v8 = vor.u32 %v236_v0, %v235_v62 }
  0xbc   :  { %v240_v9 = vor.u32 %v239_v3, %v238_v1  ;;  %vm242_vm6 = vcmp.lt.s32.totalorder %v1239_v50, 2  ;;  %v990_v24 = vor.u32 %v989_v7, %v988_v15  ;;  %vm985_vm7 = vcmp.lt.f32.partialorder %v984_v18, 8388608.0 }
  0xbd   :  { %v249_v11 = vsel %vm241_vm3, %v1248_v4, %v1250_v5  ;;  %v253_v12 = vsel %vm241_vm3, %v1250_v5, %v1252_v6  ;;  %v250_v13 = vsel %vm244_vm5, %v237_v8, 920167782  ;;  %v1071_v47 = vmov 0  }
  0xbe   :  { %v254_v14 = vsel %vm244_vm5, %v240_v9, 1326507024  ;;  %v251_v16 = vsel %vm243_vm4, %v1252_v6, %v250_v13  ;;  %v991_v34 = vsel %vm985_vm7, %v990_v24, %v1234_v46  ;;  %v1072_v59 = vmov 0.0  }
  0xbf   :  { %v255_v17 = vsel %vm243_vm4, %v237_v8, %v254_v14  ;;  %v252_v20 = vsel %vm242_vm6, %v249_v11, %v251_v16  ;;  %v677_v43 = vmax.f32 %v991_v34, 0.0  ;;  %v246_v13 = vsel %vm244_vm5, %v1252_v6, 2102212464 }
  0xc0   :  { %v256_v21 = vsel %vm242_vm6, %v253_v12, %v255_v17  ;;  %v282_v28 = vand.u32 65535, %v252_v20  ;;  %v283_v29 = vshrl.u32 %v252_v20, 16  ;;  %v225_v15 = vshrl.u32 %v1065_v51, %v1236_v48 }
  0xc1   :  { %v260_v25 = vand.u32 65535, %v256_v21  ;;  %v261_v27 = vshrl.u32 %v256_v21, 16  ;;  %v678_v55 = vmin.f32 %v677_v43, 16.0  ;;  %v247_v18 = vsel %vm243_vm4, %v1250_v5, %v246_v13 }
  0xc2   :  { %v285_v32 = vmul.u32 %v283_v29, %v258_v49  ;;  %v286_v30 = vmul.u32 %v282_v28, %v259_v22  ;;  %v284_v38 = vmul.u32 %v282_v28, %v258_v49  ;;  %v287_v39 = vmul.u32 %v283_v29, %v259_v22 }
  0xc3   :  { %v263_v19 = vmul.u32 %v261_v27, %v258_v49  ;;  %v264_v31 = vmul.u32 %v260_v25, %v259_v22  ;;  %v262_v35 = vmul.u32 %v260_v25, %v258_v49  ;;  %v265_v37 = vmul.u32 %v261_v27, %v259_v22 }
  0xc4   :  { %v288_v40 = vshll.u32 %v285_v32, 16  ;;  %v290_v53 = vshll.u32 %v286_v30, 16  ;;  %vm683_vm13 = vcmp.eq.f32.partialorder %v678_v55, %v1008_v45  ;;  %v289_v1 = vshrl.u32 %v285_v32, 16 }
  0xc5   :  { %v266_v36 = vshll.u32 %v263_v19, 16  ;;  %v268_v41 = vshll.u32 %v264_v31, 16  ;;  %v980_v60 = vsel %vm683_vm13, 1.0, %v1072_v59  ;;  %v267_v2 = vshrl.u32 %v263_v19, 16 }
  0xc6   :  { %vm292_vm9 = vc.u32 %v284_v38, %v288_v40  ;;  %v294_v54 = vadd.s32 %v288_v40, %v284_v38  ;;  %981 = vmatmul.msk.f32.vlgmr.msra.gmra.mxu1 %vm695_vm12, %v980_v60  ;;  %v697_v62 = vsel %vm695_vm12, %v980_v60, 0  ;;  %v291_v10 = vshrl.u32 %v286_v30, 16 }
  0xc7   :  { %vm270_vm8 = vc.u32 %v262_v35, %v266_v36  ;;  %v272_v42 = vadd.s32 %v266_v36, %v262_v35  ;;  %v293_v46 = vsel %vm292_vm9, 1, %v1071_v47  ;;  %v728_v0 = vsub.f32 %v697_v62, %v697_v62 }
  0xc8   :  { %v271_v52 = vsel %vm270_vm8, 1, %v1071_v47  ;;  %v295_v49 = vadd.s32 %v293_v46, %v287_v39  ;;  %vm296_vm11 = vc.u32 %v294_v54, %v290_v53  ;;  %v269_v11 = vshrl.u32 %v264_v31, 16 }
  0xc9   :  { %vm274_vm10 = vc.u32 %v272_v42, %v268_v41  ;;  %v273_v56 = vadd.s32 %v271_v52, %v265_v37  ;;  %v297_v58 = vsel %vm296_vm11, 1, %v1071_v47  ;;  %838 = vmatmul.f32.vlgmr.msra.gmra.mxu2 %v728_v0  ;;  %v729_v3 = vand.u32 4294901760, %v728_v0 }
  0xca   :  { %v275_v57 = vsel %vm274_vm10, 1, %v1071_v47  ;;  %v299_v61 = vadd.s32 %v297_v58, %v295_v49  ;;  %v245_v17 = vsel %vm241_vm3, %v225_v15, %v1248_v4  ;;  %v298_v20 = vadd.s32 %v294_v54, %v290_v53 }
  0xcb   :  { %v277_v63 = vadd.s32 %v275_v57, %v273_v56  ;;  %870 = vmatmul.f32.vlgmr.msra.gmra.mxu3 %v729_v3  ;;  %v730_v9 = vsub.f32 %v728_v0, %v729_v3  ;;  %v248_v6 = vsel %vm242_vm6, %v245_v17, %v247_v18  ;;  %vm352_vm6 = vweird.f32 %v1221_v26 }
  0xcc   :  { %v300_v7 = vadd.s32 %v299_v61, %v289_v1  ;;  %v302_v24 = vmul.u32 %v1232_v44, %v248_v6 }
  0xcd   :  { %v278_v8 = vadd.s32 %v277_v63, %v267_v2  ;;  %v731_v12 = vand.u32 4294901760, %v730_v9 }
  0xce   :  { %v301_v14 = vadd.s32 %v300_v7, %v291_v10  ;;  %983 = vmatmul.msk.f32.vlgmr.msrb.gmra.mxu1 %vm695_vm12, %v980_v60 }
  0xcf   :  { %v279_v16 = vadd.s32 %v278_v8, %v269_v11  ;;  %732 = vmatmul.f32.vlgmr.msra.gmra.mxu0 %v731_v12 }
  0xd0   :  { %v305_v21 = vadd.s32 1, %v301_v14 }
  0xd1   :  { %vm304_vm14 = vc.u32 %v279_v16, %v298_v20  ;;  %v303_v34 = vadd.s32 %v298_v20, %v279_v16  ;;  %v1005_v20 = vld [vmem:[%s1333_s3] ss:$0 sm:$0xff] }
  0xd2   :  { %v306_v22 = vsel %vm304_vm14, %v305_v21, %v301_v14  ;;  %v1006_v14 = vld [vmem:[%s1333_s3 + $0x1] ss:$0 sm:$0xff] }
  0xd3   :  { %v307_v48 = vadd.s32 %v306_v22, %v302_v24 }
  0xd5   :  { %v308_v51 = vadd.s32 536870912, %v307_v48 }
  0xd7   :  { %982 = vmatmul.msk.f32.vlgmr.msrb.gmra.mxu0 %vm695_vm12, %v980_v60  ;;  %v309_v25 = vshrl.u32 %v308_v51, 30  ;;  %v207_v51 = vmul.f32 %v1005_v20, %v1213_v23 }
  0xd9   :  { %v310_v27 = vshll.u32 %v309_v25, 30  ;;  %v333_v49 = vsub.s32 4, %v309_v25 }
  0xdb   :  { %v311_v4 = vsub.s32 %v307_v48, %v310_v27  ;;  %v334_v59 = vsel %vm211_vm1, %v333_v49, %v309_v25  ;;  %v1007_v25 = vld [vmem:[%s1333_s3 + $0x2] ss:$0 sm:$0xff] }
  0xdc   :  { %v336_v61 = vsel %vm210_vm2, 0, %v334_v59 }
  0xdd   :  { %v313_v28 = vsub.s32 0, %v311_v4  ;;  %vm312_vm15 = vcmp.lt.s32.totalorder %v311_v4, 0  ;;  %v353_v0 = vadd.s32 3, %v336_v61  ;;  %v512_v9 = vand.u32 3, %v336_v61 }
  0xdf   :  { %v314_v29 = vsel %vm312_vm15, %v313_v28, %v311_v4  ;;  %v354_v2 = vand.u32 3, %v353_v0  ;;  %vm514_vm7 = vcmp.eq.s32.totalorder %v512_v9, 0  ;;  %vm517_vm8 = vcmp.eq.s32.totalorder %v512_v9, 2 }
  0xe0   :  { %v315_v5 = vclz %v314_v29  ;;  %vm513_vm9 = vcmp.lt.s32.totalorder %v512_v9, 2 }
  0xe1   :  { %vm356_vm3 = vcmp.eq.s32.totalorder %v354_v2, 0  ;;  %vm359_vm4 = vcmp.eq.s32.totalorder %v354_v2, 2  ;;  %vm355_vm5 = vcmp.lt.s32.totalorder %v354_v2, 2 }
  0xe2   :  { %v975_v19 = vadd.s32 4294967294, %v315_v5 }
  0xe4   :  { %vm976_vm0 = vcmp.lt.s32.totalorder %v975_v19, 0 }
  0xe5   :  { %v318_v31 = vsel %vm976_vm0, 0, %v975_v19  ;;  %v1009_v19 = vld [vmem:[%s1333_s3 + $0x3] ss:$0 sm:$0xff] }
  0xe6   :  { %v323_v32 = vsub.s32 4294967266, %v318_v31  ;;  %v319_v30 = vsub.s32 32, %v318_v31  ;;  %v320_v36 = vshll.u32 %v311_v4, %v318_v31 }
  0xe8   :  { %v324_v50 = vadd.s32 127, %v323_v32  ;;  %v321_v44 = vshrl.u32 %v303_v34, %v319_v30 }
  0xea   :  { %v325_v35 = vshll.u32 %v324_v50, 23  ;;  %v322_v38 = vor.u32 %v321_v44, %v320_v36 }
  0xec   :  { %v326_v37 = vor.u32 4788187, %v325_v35  ;;  %v329_v40 = vcvt.s32.f32 %v322_v38 }
  0xee   :  { %v327_v39 = vand.u32 2147483647, %v326_v37 }
  0xf0   :  { %v330_v41 = vmul.f32 %v329_v40, %v327_v39 }
  0xf2   :  { %v331_v42 = vxor.u32 2147483648, %v330_v41 }
  0xf4   :  { %v332_v43 = vsel %vm211_vm1, %v331_v42, %v330_v41 }
  0xf5   :  { %v335_v45 = vsel %vm210_vm2, %v1221_v26, %v332_v43 }
  0xf6   :  { %v337_v47 = vmul.f32 %v335_v45, %v335_v45 }
  0xf8   :  { %v345_v52 = vmul.f32 -0.00019511016, %v337_v47  ;;  %v338_v54 = vmul.f32 -0.001358992, %v337_v47 }
  0xfa   :  { %v346_v53 = vadd.f32 0.008332121, %v345_v52  ;;  %v339_v55 = vadd.f32 0.041655596, %v338_v54 }
  0xfc   :  { %v347_v46 = vmul.f32 %v346_v53, %v337_v47  ;;  %v340_v57 = vmul.f32 %v339_v55, %v337_v47 }
  0xfe   :  { %v348_v56 = vadd.f32 -0.16666654, %v347_v46  ;;  %v341_v60 = vadd.f32 -0.4999988, %v340_v57 }
 0x100   :  { %v349_v58 = vmul.f32 %v348_v56, %v337_v47  ;;  %v342_v63 = vmul.f32 %v341_v60, %v337_v47 }
 0x102   :  { %v350_v62 = vadd.f32 1.0, %v349_v58  ;;  %v343_v33 = vadd.f32 1.0, %v342_v63 }
 0x104   :  { %v351_v1 = vmul.f32 %v350_v62, %v335_v45  ;;  %v360_v7 = vxor.u32 2147483648, %v343_v33 }
 0x106   :  { %v357_v3 = vxor.u32 2147483648, %v351_v1  ;;  %v361_v10 = vsel %vm359_vm4, %v360_v7, %v351_v1  ;;  %v519_v6 = vsel %vm517_vm8, %v360_v7, %v351_v1 }
 0x108   :  { %v358_v8 = vsel %vm356_vm3, %v343_v33, %v357_v3  ;;  %v516_v17 = vsel %vm514_vm7, %v343_v33, %v357_v3 }
 0x109   :  { %v362_v11 = vsel %vm355_vm5, %v358_v8, %v361_v10  ;;  %v520_v24 = vsel %vm513_vm9, %v516_v17, %v519_v6 }
 0x10a   :  { %v363_v16 = vsel %vm352_vm6, nan, %v362_v11  ;;  %v521_v4 = vsel %vm352_vm6, nan, %v520_v24 }
 0x10b   :  { %v365_v22 = vmul.f32 %v1006_v14, %v363_v16  ;;  %v523_v32 = vmul.f32 %v1007_v25, %v521_v4 }
 0x10d   :  { %v366_v29 = vadd.f32 %v365_v22, %v207_v51 }
 0x10f   :  { %v524_v23 = vadd.f32 %v523_v32, %v366_v29 }
 0x143   :  { %v799_v12 = vpop.f32.mrf.mxu1 }
 0x14b   :  { %v949_v31 = vpop.f32.mrf.mxu1 }
 0x14c   :  { %v733_v13 = vpop.f32.mrf.mxu0  ;;  %v839_v18 = vpop.f32.mrf.mxu2 }
 0x14d   :  { %v800_v15 = vadd.f32 %v799_v12, %v733_v13 }
 0x14e   :  { %v871_v48 = vpop.f32.mrf.mxu3 }
 0x14f   :  { %v840_v21 = vadd.f32 %v839_v18, %v800_v15 }
 0x151   :  { %v872_v27 = vadd.f32 %v871_v48, %v840_v21 }
 0x154   :  { %v919_v28 = vpop.f32.mrf.mxu0 }
 0x155   :  { %v920_v5 = vadd.f32 %v919_v28, %v872_v27 }
 0x157   :  { %v950_v50 = vadd.f32 %v949_v31, %v920_v5 }
 0x159   :  { %v954_v30 = vmul.f32 %v1009_v19, %v950_v50 }
 0x15b   :  { %v955_v26 = vadd.f32 %v954_v30, %v524_v23 }
 0x15d   :  { %956 = vst.msk [vmem:[#allocation5] sm:$0xff] %vm695_vm12, %v955_v26 }
 0x15e   :  { %967 = dma.vmem_to_hbm [thread:$0]  %s963_s21, 128, %s965_s24, [#allocation4]  }
 0x15f   :  { %1060 = dma.done.wait [#allocation4], 128  }
 0x160   :  { %1061 = vsyncadd [#allocation4], 4294967168 }
 0x161   :  { %972 = vsyncpa [#allocation3], 1 }
 0x162   :  { %973 = vsyncpa [#allocation4], 1 }

</bundles_post_ra>
